<compile_context>
chip_gen: v7x
topology: tpu7x:2x2x1
jax: 0.10.0
libtpu: 0.0.40
codegen_flags: <defaults>
</compile_context>

<pallas_src>
import functools
import math

import jax
import jax.numpy as jnp
from jax.experimental import pallas as pl
from jax.experimental.pallas import tpu as pltpu


def _round_up(x, m):
    return ((x + m - 1) // m) * m


def ffn_kernel(x_ref, w1_ref, b1_ref, w2_ref, b2_ref, g_ref, beta_ref, o_ref,
               *, d_valid):
    # x: (TM, Dp) in native dtype; weights in native dtype; biases/ln params f32.
    x = x_ref[...]

    # linear1 + relu  (MXU consumes native dtype, accumulates in f32)
    h = jnp.dot(x, w1_ref[...], preferred_element_type=jnp.float32)
    h = jnp.maximum(h + b1_ref[...], 0.0)

    # linear2 (cast activations back to weight dtype for the MXU fast path)
    t2 = jnp.dot(h.astype(w2_ref.dtype), w2_ref[...],
                 preferred_element_type=jnp.float32) + b2_ref[...]

    # residual add in f32
    y = x.astype(jnp.float32) + t2

    d_pad = y.shape[-1]
    if d_valid != d_pad:
        # mask out padded lanes so they don't pollute the LayerNorm stats
        lane = jax.lax.broadcasted_iota(jnp.int32, (1, d_pad), 1)
        mask = (lane < d_valid).astype(jnp.float32)
        y = y * mask

    # LayerNorm over the valid d_model lanes (eps=1e-5, biased variance,
    # matching torch.nn.LayerNorm)
    inv_d = 1.0 / d_valid
    mean = jnp.sum(y, axis=-1, keepdims=True) * inv_d
    yc = y - mean
    if d_valid != d_pad:
        yc = yc * mask
    var = jnp.sum(yc * yc, axis=-1, keepdims=True) * inv_d
    inv = jax.lax.rsqrt(var + 1e-5)
    out = yc * inv * g_ref[...] + beta_ref[...]

    o_ref[...] = out.astype(o_ref.dtype)


def ffn_layer(tgt, w1, b1, w2, b2, gamma, beta, *, tm=512):
    """tgt: (seq, batch, d_model). Returns same shape/dtype.

    w1: (d_model, dff), w2: (dff, d_model) -- applied as x @ w.
    """
    seq, bsz, d_model = tgt.shape
    dff = w1.shape[1]
    n = seq * bsz

    d_pad = _round_up(d_model, 128)   # lane-dense last dim
    f_pad = _round_up(dff, 128)

    # Zero-padding is exact: padded x cols / w1 rows / w2 cols contribute 0.
    x2d = jnp.pad(tgt.reshape(n, d_model), ((0, 0), (0, d_pad - d_model)))
    w1p = jnp.pad(w1, ((0, d_pad - d_model), (0, f_pad - dff)))
    w2p = jnp.pad(w2, ((0, f_pad - dff), (0, d_pad - d_model)))
    b1p = jnp.pad(b1.astype(jnp.float32), (0, f_pad - dff)).reshape(1, f_pad)
    b2p = jnp.pad(b2.astype(jnp.float32), (0, d_pad - d_model)).reshape(1, d_pad)
    gp = jnp.pad(gamma.astype(jnp.float32), (0, d_pad - d_model)).reshape(1, d_pad)
    bp = jnp.pad(beta.astype(jnp.float32), (0, d_pad - d_model)).reshape(1, d_pad)

    # Row tile: multiple of 8 (f32 sublane) unless it covers all rows.
    tm = min(tm, n)
    if tm < n:
        tm = max(8, (tm // 8) * 8)
    grid = (pl.cdiv(n, tm),)

    kernel = functools.partial(ffn_kernel, d_valid=d_model)

    out2d = pl.pallas_call(
        kernel,
        out_shape=jax.ShapeDtypeStruct((n, d_pad), tgt.dtype),
        grid=grid,
        in_specs=[
            pl.BlockSpec((tm, d_pad), lambda i: (i, 0)),       # x: per-tile
            pl.BlockSpec((d_pad, f_pad), lambda i: (0, 0)),    # w1: resident
            pl.BlockSpec((1, f_pad), lambda i: (0, 0)),        # b1: resident
            pl.BlockSpec((f_pad, d_pad), lambda i: (0, 0)),    # w2: resident
            pl.BlockSpec((1, d_pad), lambda i: (0, 0)),        # b2: resident
            pl.BlockSpec((1, d_pad), lambda i: (0, 0)),        # gamma
            pl.BlockSpec((1, d_pad), lambda i: (0, 0)),        # beta
        ],
        out_specs=pl.BlockSpec((tm, d_pad), lambda i: (i, 0)),
        compiler_params=pltpu.CompilerParams(
            dimension_semantics=("parallel",)),                # rows independent
    )(x2d, w1p, b1p, w2p, b2p, gp, bp)

    return out2d[:, :d_model].reshape(seq, bsz, d_model)


def xavier_uniform(key, fan_in, fan_out, dtype=jnp.float32):
    # matches torch.nn.init.xavier_uniform_ with gain=1
    a = math.sqrt(6.0 / (fan_in + fan_out))
    return jax.random.uniform(key, (fan_in, fan_out), dtype, minval=-a, maxval=a)


if __name__ == "__main__":
    d_model = 32
    dim_feedforward = 64
    seq, bsz = 8, 2

    key = jax.random.PRNGKey(0)
    k_x, k_w1, k_b1, k_w2, k_b2 = jax.random.split(key, 5)

    tgt = jax.random.normal(k_x, (seq, bsz, d_model), jnp.float32)

    # Parameters (weights xavier-uniform as in _reset_parameters, biases
    # small uniform like torch Linear default).
    w1 = xavier_uniform(k_w1, d_model, dim_feedforward)          # x @ w1
    b1 = jax.random.uniform(k_b1, (dim_feedforward,), jnp.float32,
                            minval=-1.0 / math.sqrt(d_model),
                            maxval=1.0 / math.sqrt(d_model))
    w2 = xavier_uniform(k_w2, dim_feedforward, d_model)          # h @ w2
    b2 = jax.random.uniform(k_b2, (d_model,), jnp.float32,
                            minval=-1.0 / math.sqrt(dim_feedforward),
                            maxval=1.0 / math.sqrt(dim_feedforward))
    gamma = jnp.ones((d_model,), jnp.float32)
    beta = jnp.zeros((d_model,), jnp.float32)

    # Small row tile so the demo exercises the multi-step grid / resident weights.
    out = ffn_layer(tgt, w1, b1, w2, b2, gamma, beta, tm=8)
    out = jax.block_until_ready(out)

    # pure-JAX reference check (forward_post, dropout=0)
    x2d = tgt.reshape(-1, d_model)
    h = jnp.maximum(x2d @ w1 + b1, 0.0)
    y = x2d + (h @ w2 + b2)
    mu = y.mean(-1, keepdims=True)
    var = ((y - mu) ** 2).mean(-1, keepdims=True)
    ref = ((y - mu) / jnp.sqrt(var + 1e-5)) * gamma + beta
    ref = ref.reshape(seq, bsz, d_model)
    assert jnp.allclose(out, ref, atol=1e-5, rtol=1e-5), "mismatch vs reference"

    print("KERNEL_OK")
</pallas_src>

<mosaic_0001>
module attributes {stable_mosaic.version = 11 : i64} {
  func.func @ffn_kernel(%arg0: i32, %arg1: memref<8x128xf32, #tpu.memory_space<vmem>>, %arg2: memref<128x128xf32, #tpu.memory_space<vmem>>, %arg3: memref<1x128xf32, #tpu.memory_space<vmem>>, %arg4: memref<128x128xf32, #tpu.memory_space<vmem>>, %arg5: memref<1x128xf32, #tpu.memory_space<vmem>>, %arg6: memref<1x128xf32, #tpu.memory_space<vmem>>, %arg7: memref<1x128xf32, #tpu.memory_space<vmem>>, %arg8: memref<8x128xf32, #tpu.memory_space<vmem>>) attributes {dimension_semantics = [#tpu.dimension_semantics<parallel>], iteration_bounds = array<i64: 2>, scalar_prefetch = 0 : i64, scratch_operands = 0 : i64, tpu.core_type = #tpu.core_type<tc>, window_params = [{transform_indices = @transform_0, window_bounds = array<i64: 8, 128>}, {pipeline_mode = #tpu.pipeline_mode<synchronous>, transform_indices = @transform_1, window_bounds = array<i64: 128, 128>}, {pipeline_mode = #tpu.pipeline_mode<synchronous>, transform_indices = @transform_2, window_bounds = array<i64: 1, 128>}, {pipeline_mode = #tpu.pipeline_mode<synchronous>, transform_indices = @transform_3, window_bounds = array<i64: 128, 128>}, {pipeline_mode = #tpu.pipeline_mode<synchronous>, transform_indices = @transform_4, window_bounds = array<i64: 1, 128>}, {pipeline_mode = #tpu.pipeline_mode<synchronous>, transform_indices = @transform_5, window_bounds = array<i64: 1, 128>}, {pipeline_mode = #tpu.pipeline_mode<synchronous>, transform_indices = @transform_6, window_bounds = array<i64: 1, 128>}, {transform_indices = @transform_7, window_bounds = array<i64: 8, 128>}]} {
    %c0 = arith.constant 0 : index
    %c0_0 = arith.constant 0 : index
    %0 = vector.load %arg1[%c0, %c0_0] : memref<8x128xf32, #tpu.memory_space<vmem>>, vector<8x128xf32>
    %c0_1 = arith.constant 0 : index
    %c0_2 = arith.constant 0 : index
    %1 = vector.load %arg2[%c0_1, %c0_2] : memref<128x128xf32, #tpu.memory_space<vmem>>, vector<128x128xf32>
    %cst = arith.constant dense<0.000000e+00> : vector<8x128xf32>
    %2 = tpu.matmul %0, %1, %cst {dimension_numbers = #tpu.dot_dimension_numbers<[1], [0], [0], [1], [0, 0, 1, 1], [], []>} : vector<8x128xf32>, vector<128x128xf32>, vector<8x128xf32> -> vector<8x128xf32>
    %c0_3 = arith.constant 0 : index
    %c0_4 = arith.constant 0 : index
    %3 = vector.load %arg3[%c0_3, %c0_4] : memref<1x128xf32, #tpu.memory_space<vmem>>, vector<1x128xf32>
    %4 = vector.broadcast %3 : vector<1x128xf32> to vector<8x128xf32>
    %5 = arith.addf %2, %4 : vector<8x128xf32>
    %cst_5 = arith.constant 0.000000e+00 : f32
    %6 = vector.broadcast %cst_5 : f32 to vector<8x128xf32>
    %7 = arith.maximumf %5, %6 : vector<8x128xf32>
    %c0_6 = arith.constant 0 : index
    %c0_7 = arith.constant 0 : index
    %8 = vector.load %arg4[%c0_6, %c0_7] : memref<128x128xf32, #tpu.memory_space<vmem>>, vector<128x128xf32>
    %cst_8 = arith.constant dense<0.000000e+00> : vector<8x128xf32>
    %9 = tpu.matmul %7, %8, %cst_8 {dimension_numbers = #tpu.dot_dimension_numbers<[1], [0], [0], [1], [0, 0, 1, 1], [], []>} : vector<8x128xf32>, vector<128x128xf32>, vector<8x128xf32> -> vector<8x128xf32>
    %c0_9 = arith.constant 0 : index
    %c0_10 = arith.constant 0 : index
    %10 = vector.load %arg5[%c0_9, %c0_10] : memref<1x128xf32, #tpu.memory_space<vmem>>, vector<1x128xf32>
    %11 = vector.broadcast %10 : vector<1x128xf32> to vector<8x128xf32>
    %12 = arith.addf %9, %11 : vector<8x128xf32>
    %13 = arith.addf %0, %12 : vector<8x128xf32>
    %14 = tpu.iota {dimensions = array<i32: 1>} : vector<1x128xi32>
    %c32_i32 = arith.constant 32 : i32
    %15 = vector.broadcast %c32_i32 : i32 to vector<1x128xi32>
    %16 = arith.cmpi slt, %14, %15 : vector<1x128xi32>
    %17 = arith.extui %16 : vector<1x128xi1> to vector<1x128xi32>
    %18 = arith.sitofp %17 : vector<1x128xi32> to vector<1x128xf32>
    %19 = vector.broadcast %18 : vector<1x128xf32> to vector<8x128xf32>
    %20 = arith.mulf %13, %19 : vector<8x128xf32>
    %cst_11 = arith.constant dense<0.000000e+00> : vector<8xf32>
    %21 = vector.multi_reduction <add>, %20, %cst_11 [1] : vector<8x128xf32> to vector<8xf32>
    %22 = vector.shape_cast %21 : vector<8xf32> to vector<8x1xf32>
    %cst_12 = arith.constant 3.125000e-02 : f32
    %23 = vector.broadcast %cst_12 : f32 to vector<8x1xf32>
    %24 = arith.mulf %22, %23 : vector<8x1xf32>
    %25 = vector.broadcast %24 : vector<8x1xf32> to vector<8x128xf32>
    %26 = arith.subf %20, %25 : vector<8x128xf32>
    %27 = vector.broadcast %18 : vector<1x128xf32> to vector<8x128xf32>
    %28 = arith.mulf %26, %27 : vector<8x128xf32>
    %29 = arith.mulf %28, %28 : vector<8x128xf32>
    %cst_13 = arith.constant dense<0.000000e+00> : vector<8xf32>
    %30 = vector.multi_reduction <add>, %29, %cst_13 [1] : vector<8x128xf32> to vector<8xf32>
    %31 = vector.shape_cast %30 : vector<8xf32> to vector<8x1xf32>
    %cst_14 = arith.constant 3.125000e-02 : f32
    %32 = vector.broadcast %cst_14 : f32 to vector<8x1xf32>
    %33 = arith.mulf %31, %32 : vector<8x1xf32>
    %cst_15 = arith.constant 9.99999974E-6 : f32
    %34 = vector.broadcast %cst_15 : f32 to vector<8x1xf32>
    %35 = arith.addf %33, %34 : vector<8x1xf32>
    %36 = math.rsqrt %35 : vector<8x1xf32>
    %37 = vector.broadcast %36 : vector<8x1xf32> to vector<8x128xf32>
    %38 = arith.mulf %28, %37 : vector<8x128xf32>
    %c0_16 = arith.constant 0 : index
    %c0_17 = arith.constant 0 : index
    %39 = vector.load %arg6[%c0_16, %c0_17] : memref<1x128xf32, #tpu.memory_space<vmem>>, vector<1x128xf32>
    %40 = vector.broadcast %39 : vector<1x128xf32> to vector<8x128xf32>
    %41 = arith.mulf %38, %40 : vector<8x128xf32>
    %c0_18 = arith.constant 0 : index
    %c0_19 = arith.constant 0 : index
    %42 = vector.load %arg7[%c0_18, %c0_19] : memref<1x128xf32, #tpu.memory_space<vmem>>, vector<1x128xf32>
    %43 = vector.broadcast %42 : vector<1x128xf32> to vector<8x128xf32>
    %44 = arith.addf %41, %43 : vector<8x128xf32>
    %c0_20 = arith.constant 0 : index
    %c0_21 = arith.constant 0 : index
    %45 = vector.load %arg8[%c0_20, %c0_21] : memref<8x128xf32, #tpu.memory_space<vmem>>, vector<8x128xf32>
    tpu.vector_store %arg8[%c0_20, %c0_21], %44 {strides = array<i32>} : memref<8x128xf32, #tpu.memory_space<vmem>>, vector<8x128xf32>,
    return
  }
  func.func @transform_0(%arg0: i32) -> (i32, i32) {
    %c0_i32 = arith.constant 0 : i32
    %c0_i32_0 = arith.constant 0 : i32
    return %arg0, %c0_i32 : i32, i32
  }
  func.func @transform_1(%arg0: i32) -> (i32, i32) {
    %c0_i32 = arith.constant 0 : i32
    %c0_i32_0 = arith.constant 0 : i32
    %c0_i32_1 = arith.constant 0 : i32
    return %c0_i32, %c0_i32_0 : i32, i32
  }
  func.func @transform_2(%arg0: i32) -> (i32, i32) {
    %c0_i32 = arith.constant 0 : i32
    %c0_i32_0 = arith.constant 0 : i32
    %c0_i32_1 = arith.constant 0 : i32
    return %c0_i32, %c0_i32_0 : i32, i32
  }
  func.func @transform_3(%arg0: i32) -> (i32, i32) {
    %c0_i32 = arith.constant 0 : i32
    %c0_i32_0 = arith.constant 0 : i32
    %c0_i32_1 = arith.constant 0 : i32
    return %c0_i32, %c0_i32_0 : i32, i32
  }
  func.func @transform_4(%arg0: i32) -> (i32, i32) {
    %c0_i32 = arith.constant 0 : i32
    %c0_i32_0 = arith.constant 0 : i32
    %c0_i32_1 = arith.constant 0 : i32
    return %c0_i32, %c0_i32_0 : i32, i32
  }
  func.func @transform_5(%arg0: i32) -> (i32, i32) {
    %c0_i32 = arith.constant 0 : i32
    %c0_i32_0 = arith.constant 0 : i32
    %c0_i32_1 = arith.constant 0 : i32
    return %c0_i32, %c0_i32_0 : i32, i32
  }
  func.func @transform_6(%arg0: i32) -> (i32, i32) {
    %c0_i32 = arith.constant 0 : i32
    %c0_i32_0 = arith.constant 0 : i32
    %c0_i32_1 = arith.constant 0 : i32
    return %c0_i32, %c0_i32_0 : i32, i32
  }
  func.func @transform_7(%arg0: i32) -> (i32, i32) {
    %c0_i32 = arith.constant 0 : i32
    %c0_i32_0 = arith.constant 0 : i32
    return %arg0, %c0_i32 : i32, i32
  }
}

</mosaic_0001>

<bundles_post_ra>
// kernel: tpu_custom_call.1
= control target key start
LH: loop header
LB: loop body
LE: loop exit
PB: predicated region body
PF: predicated region fallthrough
CT: control target
= control target key end

     0   :  { %12 = vsyncpa [#allocation3], 0  ;;  %s1371_s0 = inlined_call_operand.hbm [shape: f32[16,128], index: 0, kind: input, shape index: {}]   ;;  %s1372_s1 = inlined_call_operand.hbm [shape: f32[128,128], index: 1, kind: input, shape index: {}]   ;;  %s1373_s2 = inlined_call_operand.vmem [shape: f32[1,128], index: 2, kind: input, shape index: {}]   ;;  %s1374_s3 = inlined_call_operand.hbm [shape: f32[128,128], index: 3, kind: input, shape index: {}]   ;;  %s1375_s4 = inlined_call_operand.vmem [shape: f32[1,128], index: 4, kind: input, shape index: {}]   ;;  %s1376_s5 = inlined_call_operand.vmem [shape: f32[1,128], index: 5, kind: input, shape index: {}]   ;;  %s1377_s6 = inlined_call_operand.vmem [shape: f32[1,128], index: 6, kind: input, shape index: {}]   ;;  %s1378_s7 = inlined_call_operand.hbm [shape: f32[16,128], index: 7, kind: output, shape index: {}]  }
   0x1   :  { %14 = vsyncpa [#allocation3 + $0x1], 0 }
   0x2   :  { %15 = vsyncpa [#allocation6], 0 }
   0x3   :  { %16 = vsyncpa [#allocation4], 0 }
   0x4   :  { %18 = vsyncpa [#allocation4 + $0x1], 0  ;;  %s1104_s24 = smov 0   ;;  %s1106_s25 = smov 0  }
   0x5   :  { %s1108_s26 = smov 0   ;;  %s1110_s27 = smov 0  }
   0x6 LB: > { %s1125_s28 = sadd.s32 4294967295, %s1053_s27   ;;  %s650_s29 = sadd.s32 4294967294, %s1053_s27   ;;  %s1053_s27 = sphi %s1110_s27, %s1398_s27   ;;  %s1049_s26 = sphi %s1108_s26, %s1397_s26   ;;  %s1045_s25 = sphi %s1106_s25, %s1396_s25   ;;  %s1041_s24 = sphi %s1104_s24, %s1395_s24  }
   0x7   : > { %p44_p0 = scmp.ne.s32.totalorder %s1045_s25, %s1041_s24  ;;  %p1379_p1 = scmp.eq.s32.totalorder %s1125_s28, 0 }
   0x8   : > { %p200_p3 = scmp.eq.s32.totalorder %s650_s29, 1  ;;  %p651_p5 = scmp.ge.s32.totalorder %s1053_s27, 1 }
   0x9   : > { %p1134_p4 = por %p1379_p1, %p44_p0  ;;  %p207_p7 = scmp.lt.s32.totalorder %s1053_s27, 3 }
   0xa   : > { %p1139_p6 = por %p200_p3, %p44_p0  ;;  %s1055_s10 = smov [#allocation5]  }
   0xb   : > { %s1382_s30 = scalar_select %p1134_p4, 1, 0 }
   0xc   : > { %s1383_s8 = scalar_select %p1139_p6, 1, 0 }
   0xd   : > { %p1144_p8 = pnand %p651_p5, %p207_p7  ;;  %s219_s11 = sshll.u32 %s1055_s10, 4  ;;  %s1148_s11 = int_to_ptr.vmem [resolvable:$true] %s219_s11 }
   0xe   : > { %s1056_s13 = smov [#allocation7]   ;;  %s897_s17 = scalar_lea.hbm %s1372_s1, 2048 }
   0xf   : > { %p835_p9 = pneg %p1144_p8  ;;  %s235_s14 = sshll.u32 %s1056_s13, 4  ;;  %s1159_s14 = int_to_ptr.vmem [resolvable:$true] %s235_s14 }
  0x10   : > { %p898_p12 = scmp.ne.s32.totalorder %s1372_s1, %s897_s17  ;;  %p904_p5 = scmp.lt.u32.totalorder %s897_s17, %s1372_s1 }
  0x11   : > { %p1155_p11 = pnand %p835_p9, %p1379_p1 }
  0x13   : > { %p899_p13 = pneg %p1155_p11 }
  0x15   : > { %p900_p0 = pnand %p899_p13, %p898_p12 }
  0x17   : > { %p901_p3 = pneg %p900_p0 }
  0x19   : > { %p906_p7 = pnand %p904_p5, %p901_p3 }
  0x1b   : > { %909 = shalt.err (!%p906_p7)
}
  0x1c   : > { %s910_s22 = scalar_lea.vmem %s1148_s11, 2048  ;;  %p918_p2 = scmp.lt.s32.totalorder %s1148_s11, %s1148_s11 }
  0x1d   : > { %p911_p9 = scmp.ne.s32.totalorder %s1148_s11, %s910_s22  ;;  %p919_p12 = scmp.lt.s32.totalorder %s910_s22, %s910_s22 }
  0x1f   : > { %p913_p10 = pnand %p911_p9, %p899_p13  ;;  %p920_p0 = por %p919_p12, %p918_p2 }
  0x21   : > { %p914_p1 = pneg %p913_p10 }
  0x23   : > { %p921_p6 = pnand %p920_p0, %p914_p1 }
  0x25   : > { %924 = shalt.err (!%p921_p6)
}
  0x26   : > { %s1057_s23 = smov 128   ;;  %s1058_s29 = smov 8  }
  0x27   : > { %838 = dma.hbm_to_vmem [thread:$0]  (!%p1155_p11), %s1372_s1, 2048, %s1148_s11, [#allocation6], %s1057_s23, %s1057_s23, %s1058_s29  }
  0x28   : > { %s925_s17 = scalar_lea.hbm %s1374_s3, 2048 }
  0x29   : > { %p926_p2 = scmp.ne.s32.totalorder %s1374_s3, %s925_s17  ;;  %p932_p10 = scmp.lt.u32.totalorder %s925_s17, %s1374_s3 }
  0x2b   : > { %p928_p1 = pnand %p926_p2, %p899_p13 }
  0x2d   : > { %p929_p6 = pneg %p928_p1 }
  0x2f   : > { %p934_p3 = pnand %p932_p10, %p929_p6 }
  0x31   : > { %937 = shalt.err (!%p934_p3)
}
  0x32   : > { %s938_s11 = scalar_lea.vmem %s1159_s14, 2048  ;;  %p946_p12 = scmp.lt.s32.totalorder %s1159_s14, %s1159_s14 }
  0x33   : > { %p939_p5 = scmp.ne.s32.totalorder %s1159_s14, %s938_s11  ;;  %p947_p0 = scmp.lt.s32.totalorder %s938_s11, %s938_s11 }
  0x35   : > { %p941_p7 = pnand %p939_p5, %p899_p13  ;;  %p948_p2 = por %p947_p0, %p946_p12 }
  0x37   : > { %p942_p9 = pneg %p941_p7 }
  0x39   : > { %p949_p1 = pnand %p948_p2, %p942_p9 }
  0x3b   : > { %952 = shalt.err (!%p949_p1)
}
  0x3c   : > { %841 = dma.hbm_to_vmem [thread:$0]  (!%p1155_p11), %s1374_s3, 2048, %s1159_s14, [#allocation6], %s1057_s23, %s1057_s23, %s1058_s29  }
  0x3d   : > { %s1214_s13 = sadd.s32 1, %s1053_s27   ;;  %s31_s12 = sadd.s32 1, %s1049_s26 }
  0x3e   : > { %s28_s15 = ssub.s32 %s1053_s27, %s1214_s13  ;;  %p38_p13 = scmp.ne.s32.totalorder %s1049_s26, %s1045_s25 }
  0x3f   : > { %p29_p6 = scmp.eq.s32.totalorder %s28_s15, 0  ;;  %p39_p10 = scmp.eq.s32.totalorder %s1053_s27, 0 }
  0x40   : > { %p1386_p3 = scmp.eq.s32.totalorder %s1125_s28, 1  ;;  %p852_p7 = scmp.lt.s32.totalorder %s1053_s27, 2 }
  0x41   : > { %s1230_s17 = scalar_select %p29_p6, %s1049_s26, %s31_s12  }
  0x42   : > { %p1224_p5 = por %p1386_p3, %p38_p13  ;;  %p40_p9 = por %p39_p10, %p38_p13 }
  0x43   : > { %s258_s18 = sand.u32 1, %s1049_s26   ;;  %s656_s14 = sshll.u32 %s1053_s27, 7 }
  0x44   : > { %s1387_s16 = scalar_select %p1224_p5, 1, 0 }
  0x45   : > { %s655_s19 = sshll.u32 %s258_s18, 3  ;;  %s1237_s20 = scalar_lea.hbm %s1371_s0, %s656_s14 }
  0x46   : > { %s262_s21 = scalar_lea.vmem [#allocation2], %s655_s19  ;;  %p1241_p11 = pnand %p852_p7, %p40_p9 }
  0x47   : > { %s269_s11 = sshll.u32 %s262_s21, 4  ;;  %s259_s10 = scalar_lea.sflag [#allocation3], %s258_s18  ;;  %s1239_s11 = int_to_ptr.vmem [resolvable:$true] %s269_s11 }
  0x48   : > { %s953_s12 = scalar_lea.hbm %s1237_s20, 128  ;;  %p955_p0 = pneg %p1241_p11 }
  0x49   : > { %p954_p12 = scmp.ne.s32.totalorder %s1237_s20, %s953_s12  ;;  %s958_s14 = scalar_lea.hbm %s1371_s0, 256 }
  0x4a   : > { %p959_p13 = scmp.lt.u32.totalorder %s1237_s20, %s1371_s0  ;;  %p960_p6 = scmp.lt.u32.totalorder %s958_s14, %s953_s12 }
  0x4b   : > { %p956_p2 = pnand %p955_p0, %p954_p12  ;;  %p962_p3 = scmp.lt.u32.totalorder %s953_s12, %s1237_s20 }
  0x4c   : > { %p961_p10 = por %p960_p6, %p959_p13 }
  0x4d   : > { %p957_p1 = pneg %p956_p2 }
  0x4e   : > { %p963_p7 = por %p962_p3, %p961_p10 }
  0x50   : > { %p964_p9 = pnand %p963_p7, %p957_p1 }
  0x52   : > { %967 = shalt.err (!%p964_p9)
}
  0x53   : > { %s968_s18 = scalar_lea.vmem %s1239_s11, 128  ;;  %s1059_s21 = smov [#allocation2]  }
  0x54   : > { %p969_p12 = scmp.ne.s32.totalorder %s1239_s11, %s968_s18  ;;  %s973_s15 = sshll.u32 %s1059_s21, 4  ;;  %s974_s15 = int_to_ptr.vmem [resolvable:$false] %s973_s15 }
  0x55   : > { %s975_s19 = scalar_lea.vmem %s974_s15, 256  ;;  %p976_p4 = scmp.lt.s32.totalorder %s1239_s11, %s974_s15 }
  0x56   : > { %p971_p2 = pnand %p969_p12, %p955_p0  ;;  %p977_p13 = scmp.lt.s32.totalorder %s975_s19, %s968_s18 }
  0x58   : > { %p972_p5 = pneg %p971_p2  ;;  %p978_p6 = por %p977_p13, %p976_p4 }
  0x5a   : > { %p979_p10 = pnand %p978_p6, %p972_p5 }
  0x5c   : > { %982 = shalt.err (!%p979_p10)
}
  0x5d   : > { %845 = dma.hbm_to_vmem [thread:$0]  (!%p1241_p11), %s1237_s20, 128, %s1239_s11, %s259_s10  }
  0x5e   : > { %278 = sbr.rel (%p1144_p8) target bundleno = 900 (0x384), region = 48  ;;  %s1273_s12 = sand.u32 (!%p1144_p8), 1, %s1045_s25  }
  0x5f   : > { %s658_s14 = sshll.u32 (!%p1144_p8), %s1273_s12, 3  ;;  %s281_s23 = scalar_lea.sflag (!%p1144_p8), [#allocation3], %s1273_s12 }
  0x60   : > { %s1279_s29 = scalar_lea.vmem (!%p1144_p8), [#allocation2], %s658_s14  ;;  %p1389_p4 = scmp.ne.s32.totalorder (!%p1144_p8), %s1382_s30, 0 }
  0x65   : > { %1028 = dma.done.wait (%p1389_p4), %s281_s23, 128  }
  0x66   : > { %1030 = vsyncadd (%p1389_p4), %s281_s23, 4294967168  ;;  %p1390_p5 = scmp.eq.s32.totalorder %s1125_s28, 0 }
  0x68   : > { %1032 = dma.done.wait (%p1390_p5), [#allocation6], 4096   ;;  %p1391_p8 = pmov %p1390_p5 }
  0x69   : > { %v1060_v0 = vmov 0.0|0.0   ;;  %vm1061_vm0 = vmmov 0   ;;  %v1062_v1 = vmov 0.0   ;;  %v324_v2 = vld [vmem:[#allocation5] sm:$0xff]  ;;  %v325_v3 = vld [vmem:[#allocation5 + $0x8] sm:$0xff]  ;;  %v326_v4 = vld [vmem:[#allocation5 + $0x10] sm:$0xff]  ;;  %v512_v56 = vlaneseq }
  0x6a   : > { %1034 = vsyncadd (%p1391_p8), [#allocation6], 4294963200  ;;  %775 = vmatprep.subr.bf16.mxu0 %v1060_v0  ;;  %737 = vmatprep.mubr.msk.f32.mxu0 %vm1061_vm0, %v1062_v1  ;;  %v776_v5 = vpack.c.bf16 %v325_v3, %v324_v2  ;;  %v327_v6 = vld [vmem:[#allocation5 + $0x18] sm:$0xff]  ;;  %v328_v8 = vld [vmem:[#allocation5 + $0x20] sm:$0xff]  ;;  %s668_s15 = sshll.u32 %s1125_s28, 7  ;;  %s322_s19 = scalar_lea.vmem [#allocation8], %s658_s14 }
  0x6b   : > { %799 = vmatprep.subr.bf16.mxu1 %v1060_v0  ;;  %772 = vmatprep.mubr.msk.f32.mxu1 %vm1061_vm0, %v1062_v1  ;;  %v779_v7 = vpack.c.bf16 %v327_v6, %v326_v4  ;;  %v329_v9 = vld [vmem:[#allocation5 + $0x28] sm:$0xff]  ;;  %v418_v10 = vld [vmem:[#allocation7] sm:$0xff]  ;;  %v420_v12 = vld [vmem:[#allocation7 + $0x10] sm:$0xff]  ;;  %v513_v57 = vand.u32 127, %v512_v56  ;;  %s561_s23 = sshll.u32 %s322_s19, 4  ;;  %s1327_s9 = scalar_lea.hbm %s1378_s7, %s668_s15  ;;  %s1329_s23 = int_to_ptr.vmem [resolvable:$true] %s561_s23 }
  0x6c   : > { %777 = vmatpush3.bf16.msra.mxu0 %v776_v5  ;;  %v419_v11 = vld [vmem:[#allocation7 + $0x8] sm:$0xff]  ;;  %v421_v13 = vld [vmem:[#allocation7 + $0x18] sm:$0xff]  ;;  %v782_v14 = vpack.c.bf16 %v329_v9, %v328_v8  ;;  %v330_v16 = vld [vmem:[#allocation5 + $0x30] sm:$0xff]  ;;  %s548_s20 = scalar_lea.sflag [#allocation4], %s1273_s12  ;;  %s983_s11 = scalar_lea.vmem %s1329_s23, 128 }
  0x6d   : > { %778 = vmatprep.subr.bf16.mxu0 %v1060_v0  ;;  %v800_v15 = vpack.c.bf16 %v419_v11, %v418_v10  ;;  %v331_v17 = vld [vmem:[#allocation5 + $0x38] sm:$0xff]  ;;  %v803_v18 = vpack.c.bf16 %v421_v13, %v420_v12  ;;  %v422_v19 = vld [vmem:[#allocation7 + $0x20] sm:$0xff]  ;;  %v423_v20 = vld [vmem:[#allocation7 + $0x28] sm:$0xff]  ;;  %vm514_vm1 = vcmp.lt.s32.totalorder %v513_v57, 32  ;;  %p984_p11 = scmp.ne.s32.totalorder %s1329_s23, %s983_s11  ;;  %p1392_p0 = scmp.ne.s32.totalorder %s1387_s16, 0 }
  0x6e   : > { %v785_v21 = vpack.c.bf16 %v331_v17, %v330_v16  ;;  %v332_v22 = vld [vmem:[#allocation5 + $0x40] sm:$0xff]  ;;  %v333_v23 = vld [vmem:[#allocation5 + $0x48] sm:$0xff]  ;;  %v806_v24 = vpack.c.bf16 %v423_v20, %v422_v19  ;;  %v424_v25 = vld [vmem:[#allocation7 + $0x30] sm:$0xff]  ;;  %v664_v62 = vsel %vm514_vm1, 1.0, %v1062_v1  ;;  %s1063_s28 = smov [#allocation8]  }
  0x6f   : > { %801 = vmatpush3.bf16.msra.mxu1 %v800_v15  ;;  %v425_v26 = vld [vmem:[#allocation7 + $0x38] sm:$0xff]  ;;  %v788_v27 = vpack.c.bf16 %v333_v23, %v332_v22  ;;  %v334_v28 = vld [vmem:[#allocation5 + $0x50] sm:$0xff]  ;;  %v426_v31 = vld [vmem:[#allocation7 + $0x40] sm:$0xff]  ;;  %p985_p1 = pnand %p984_p11, %p1392_p0  ;;  %s987_s14 = sshll.u32 %s1063_s28, 4  ;;  %s988_s14 = int_to_ptr.vmem [resolvable:$false] %s987_s14 }
  0x70   : > { %780 = vmatpush3.bf16.msra.mxu0 %v779_v7  ;;  %802 = vmatprep.subr.bf16.mxu1 %v1060_v0  ;;  %v335_v29 = vld [vmem:[#allocation5 + $0x58] sm:$0xff]  ;;  %v809_v30 = vpack.c.bf16 %v425_v26, %v424_v25  ;;  %v427_v32 = vld [vmem:[#allocation7 + $0x48] sm:$0xff]  ;;  %v336_v34 = vld [vmem:[#allocation5 + $0x60] sm:$0xff]  ;;  %s989_s22 = scalar_lea.vmem %s988_s14, 256  ;;  %p990_p7 = scmp.lt.s32.totalorder %s1329_s23, %s988_s14 }
  0x71   : > { %781 = vmatprep.subr.bf16.mxu0 %v1060_v0  ;;  %v791_v33 = vpack.c.bf16 %v335_v29, %v334_v28  ;;  %v337_v35 = vld [vmem:[#allocation5 + $0x68] sm:$0xff]  ;;  %v812_v36 = vpack.c.bf16 %v427_v32, %v426_v31  ;;  %v428_v37 = vld [vmem:[#allocation7 + $0x50] sm:$0xff]  ;;  %v429_v38 = vld [vmem:[#allocation7 + $0x58] sm:$0xff]  ;;  %p986_p3 = pneg %p985_p1  ;;  %p991_p9 = scmp.lt.s32.totalorder %s989_s22, %s983_s11 }
  0x72   : > { %v794_v39 = vpack.c.bf16 %v337_v35, %v336_v34  ;;  %v338_v40 = vld [vmem:[#allocation5 + $0x70] sm:$0xff]  ;;  %v339_v41 = vld [vmem:[#allocation5 + $0x78] sm:$0xff]  ;;  %v815_v42 = vpack.c.bf16 %v429_v38, %v428_v37  ;;  %v430_v43 = vld [vmem:[#allocation7 + $0x60] sm:$0xff] }
  0x73   : > { %804 = vmatpush3.bf16.msra.mxu1 %v803_v18  ;;  %v431_v44 = vld [vmem:[#allocation7 + $0x68] sm:$0xff]  ;;  %v797_v45 = vpack.c.bf16 %v339_v41, %v338_v40  ;;  %v323_v47 = vld [vmem:[%s1279_s29] sm:$0xff]  ;;  %p992_p12 = por %p991_p9, %p990_p7 }
  0x74   : > { %783 = vmatpush3.bf16.msra.mxu0 %v782_v14  ;;  %805 = vmatprep.subr.bf16.mxu1 %v1060_v0  ;;  %v818_v46 = vpack.c.bf16 %v431_v44, %v430_v43  ;;  %v432_v48 = vld [vmem:[#allocation7 + $0x70] sm:$0xff]  ;;  %v433_v49 = vld [vmem:[#allocation7 + $0x78] sm:$0xff] }
  0x75   : > { %784 = vmatprep.subr.bf16.mxu0 %v1060_v0  ;;  %v821_v50 = vpack.c.bf16 %v433_v49, %v432_v48  ;;  %v662_v51 = vld [vmem:[%s1373_s2] ss:$0 sm:$0xff]  ;;  %p993_p2 = pnand %p992_p12, %p986_p3 }
  0x76   : > { %v663_v58 = vld [vmem:[%s1375_s4] ss:$0 sm:$0xff] }
  0x77   : > { %807 = vmatpush3.bf16.msra.mxu1 %v806_v24  ;;  %v665_v1 = vld [vmem:[%s1376_s5] ss:$0 sm:$0xff] }
  0x78   : > { %786 = vmatpush3.bf16.msra.mxu0 %v785_v21  ;;  %808 = vmatprep.subr.bf16.mxu1 %v1060_v0  ;;  %v666_v12 = vld [vmem:[%s1377_s6] ss:$0 sm:$0xff] }
  0x79   : > { %787 = vmatprep.subr.bf16.mxu0 %v1060_v0 }
  0x7b   : > { %810 = vmatpush3.bf16.msra.mxu1 %v809_v30 }
  0x7c   : > { %789 = vmatpush3.bf16.msra.mxu0 %v788_v27  ;;  %811 = vmatprep.subr.bf16.mxu1 %v1060_v0 }
  0x7d   : > { %790 = vmatprep.subr.bf16.mxu0 %v1060_v0 }
  0x7f   : > { %813 = vmatpush3.bf16.msra.mxu1 %v812_v36 }
  0x80   : > { %792 = vmatpush3.bf16.msra.mxu0 %v791_v33  ;;  %814 = vmatprep.subr.bf16.mxu1 %v1060_v0 }
  0x81   : > { %793 = vmatprep.subr.bf16.mxu0 %v1060_v0 }
  0x83   : > { %816 = vmatpush3.bf16.msra.mxu1 %v815_v42 }
  0x84   : > { %795 = vmatpush3.bf16.msra.mxu0 %v794_v39  ;;  %817 = vmatprep.subr.bf16.mxu1 %v1060_v0 }
  0x85   : > { %796 = vmatprep.subr.bf16.mxu0 %v1060_v0 }
  0x87   : > { %819 = vmatpush3.bf16.msra.mxu1 %v818_v46 }
  0x88   : > { %798 = vmatpush3.bf16.msra.mxu0 %v797_v45  ;;  %820 = vmatprep.subr.bf16.mxu1 %v1060_v0 }
  0x8b   : > { %738 = vmatmul.mubr.f32.vlgmr.msra.gmra.mrb[0].mxu0 %v323_v47  ;;  %822 = vmatpush3.bf16.msra.mxu1 %v821_v50 }
 0x15e   : > { %v413_v52 = vpop.f32.mrb[0].mxu0 }
 0x15f   : > { %v414_v53 = vadd.f32 %v662_v51, %v413_v52  ;;  %v739_v54 = vpop.f32.mrb[1].mxu0 }
 0x161   : > { %v417_v55 = vmax.f32 %v414_v53, 0.0 }
 0x163   : > { %773 = vmatmul.mubr.f32.vlgmr.msra.gmra.mrb[0].mxu1 %v417_v55 }
 0x236   : > { %v507_v59 = vpop.f32.mrb[0].mxu1 }
 0x237   : > { %v508_v60 = vadd.f32 %v663_v58, %v507_v59  ;;  %v774_v61 = vpop.f32.mrb[1].mxu1 }
 0x239   : > { %v511_v63 = vadd.f32 %v508_v60, %v323_v47 }
 0x23b   : > { %v517_v0 = vmul.f32 %v664_v62, %v511_v63 }
 0x23d   : > { %518 = vadd.xlane.f32.xlu0 %v517_v0 }
 0x2ca   : > { %v519_v2 = vpop.xlane.xlu0 %518 }
 0x2cb   : > { %v520_v3 = vmul.f32 0.03125, %v519_v2 }
 0x2cd   : > { %v521_v4 = vsub.f32 %v517_v0, %v520_v3 }
 0x2cf   : > { %v522_v5 = vmul.f32 %v664_v62, %v521_v4 }
 0x2d1   : > { %v523_v6 = vmul.f32 %v522_v5, %v522_v5 }
 0x2d3   : > { %524 = vadd.xlane.f32.xlu0 %v523_v6 }
 0x360   : > { %v525_v7 = vpop.xlane.xlu0 %524 }
 0x361   : > { %v526_v8 = vmul.f32 0.03125, %v525_v7 }
 0x363   : > { %v527_v9 = vadd.f32 1e-05, %v526_v8 }
 0x365   : > { %895 = vrsqrt.f32 %v527_v9 }
 0x36f   : > { %v896_v10 = vpop.eup %895 }
 0x370   : > { %v529_v11 = vmul.f32 %v896_v10, %v522_v5 }
 0x372   : > { %v537_v13 = vmul.f32 %v665_v1, %v529_v11 }
 0x374   : > { %v545_v14 = vadd.f32 %v666_v12, %v537_v13 }
 0x376   : > { %546 = vst [vmem:[%s322_s19] sm:$0xff] %v545_v14 }
 0x377   : > { %996 = shalt.err (!%p993_p2)
}
 0x378   : > { %s997_s12 = scalar_lea.hbm %s1327_s9, 128  ;;  %s1001_s21 = scalar_lea.hbm %s1378_s7, 256 }
 0x379   : > { %p998_p13 = scmp.ne.s32.totalorder %s1327_s9, %s997_s12  ;;  %p1002_p4 = scmp.lt.u32.totalorder %s1327_s9, %s1378_s7 }
 0x37a   : > { %p1003_p5 = scmp.lt.u32.totalorder %s1001_s21, %s997_s12  ;;  %p1005_p11 = scmp.lt.u32.totalorder %s997_s12, %s1327_s9 }
 0x37b   : > { %p999_p6 = pnand %p998_p13, %p1392_p0 }
 0x37c   : > { %p1004_p8 = por %p1003_p5, %p1002_p4 }
 0x37d   : > { %p1000_p10 = pneg %p999_p6 }
 0x37e   : > { %p1006_p1 = por %p1005_p11, %p1004_p8 }
 0x380   : > { %p1007_p3 = pnand %p1006_p1, %p1000_p10 }
 0x382   : > { %1010 = shalt.err (!%p1007_p3)
}
 0x383   : > { %833 = dma.vmem_to_hbm [thread:$0]  (%p1392_p0), %s1329_s23, 128, %s1327_s9, %s548_s20  }
 0x384 PF: > { %s573_s29 = sand.u32 1, %s1041_s24   ;;  %p1393_p7 = scmp.ne.s32.totalorder %s1383_s8, 0 }
 0x385   : > { %p1394_p9 = scmp.ge.s32.totalorder %s1053_s27, 2  ;;  %s574_s30 = scalar_lea.sflag [#allocation4], %s573_s29 }
 0x387   : > { %p847_p12 = pnand %p1394_p9, %p1393_p7 }
 0x389   : > { %1036 = dma.done.wait (!%p847_p12), %s574_s30, 128  }
 0x38a   : > { %1038 = vsyncadd (!%p847_p12), %s574_s30, 4294967168  ;;  %p21_p2 = scmp.ge.s32.totalorder %s1214_s13, 4   ;;  %s1395_s24 = smov %s1045_s25 }
 0x38b   : > { %s1396_s25 = smov %s1049_s26  ;;  %s1397_s26 = smov %s1230_s17 }
 0x38c   : > { %s1398_s27 = smov %s1214_s13  ;;  %23 = sbr.rel (!%p21_p2) target bundleno = 6 (0x6), region = 101 }
 0x393   :  { %579 = vsyncpa [#allocation3], 1 }
 0x394   :  { %581 = vsyncpa [#allocation3 + $0x1], 1 }
 0x395   :  { %582 = vsyncpa [#allocation6], 1 }
 0x396   :  { %583 = vsyncpa [#allocation4], 1 }
 0x397   :  { %585 = vsyncpa [#allocation4 + $0x1], 1 }

</bundles_post_ra>
